<compile_context>
chip_gen: v7x
topology: tpu7x:2x2x1
jax: 0.10.0
libtpu: 0.0.40
codegen_flags: <defaults>
</compile_context>

<pallas_src>
import functools

import jax
import jax.numpy as jnp
from jax.experimental import pallas as pl
from jax.experimental.pallas import tpu as pltpu


def _erf_approx(x):
    # Abramowitz & Stegun 7.1.26 polynomial erf (max abs err ~1.5e-7), built
    # from mul/add/exp/reciprocal/where only so it is guaranteed to lower in
    # Mosaic (lax.erf lowering is not guaranteed).
    p = 0.3275911
    a1, a2, a3, a4, a5 = (0.254829592, -0.284496736, 1.421413741,
                          -1.453152027, 1.061405429)
    ax = jnp.abs(x)
    t = pl.reciprocal(1.0 + p * ax, approx=True)    # divide -> EUP slot (free)
    poly = ((((a5 * t + a4) * t + a3) * t + a2) * t + a1) * t
    y = 1.0 - poly * jnp.exp(-ax * ax)
    return jnp.where(x < 0.0, -y, y)


def _gelu_exact(x):
    # matches torch.nn.GELU() default (erf form, not tanh approximation)
    return 0.5 * x * (1.0 + _erf_approx(x * 0.7071067811865476))


def _split_attention_kernel(x_ref, w1t_ref, w2cat_ref, o_ref, *, k, c):
    # x_ref:     (BT, K, N, C)  io dtype (bf16 recommended)
    # w1t_ref:   (C, C)         f32, mlp1 weight pre-transposed (h = a @ w1t)
    # w2cat_ref: (C, K*C)       f32, mlp2 weight pre-transposed (hat = h @ w2cat)
    # o_ref:     (BT, N, C)     io dtype
    #
    # Pass 1: a = sum over N then over K, f32 accumulation, one split at a
    # time so we never hold a full f32 copy of the x block live.
    a = jnp.sum(x_ref[:, 0].astype(jnp.float32), axis=1)          # (BT, C)
    for ki in range(1, k):
        a = a + jnp.sum(x_ref[:, ki].astype(jnp.float32), axis=1)

    # MLP: batched rows through the MXU, mlp2's K matmuls fused into one.
    h = _gelu_exact(jnp.dot(a, w1t_ref[...],
                            preferred_element_type=jnp.float32))
    hat = jnp.dot(h, w2cat_ref[...],
                  preferred_element_type=jnp.float32)             # (BT, K*C)
    # chunk ki of the lane axis == reshape(b, k, c)[:, ki] in the reference.
    hats = [hat[:, ki * c:(ki + 1) * c] for ki in range(k)]

    # softmax over K (elementwise across the K lane-chunks; no lane shuffles).
    m = hats[0]
    for ki in range(1, k):
        m = jnp.maximum(m, hats[ki])
    exps = [jnp.exp(hh - m) for hh in hats]
    denom = exps[0]
    for ki in range(1, k):
        denom = denom + exps[ki]
    inv_denom = pl.reciprocal(denom, approx=True)                 # EUP slot

    # Hoist the per-split scales once: (BT, 1, C), broadcast over N sublanes.
    scales = [(exps[ki] * inv_denom)[:, None, :] for ki in range(k)]

    # Pass 2: out = sum_k bar_a[k] * x[k]  (re-read each bf16 split from VMEM,
    # upcast per split, f32 accumulate, downcast once on store).
    out = scales[0] * x_ref[:, 0].astype(jnp.float32)             # (BT, N, C)
    for ki in range(1, k):
        out = out + scales[ki] * x_ref[:, ki].astype(jnp.float32)
    o_ref[...] = out.astype(o_ref.dtype)


def split_attention(x_all, w1, w2):
    """Pallas SplitAttention forward.

    x_all: (B, K, N, C), any float dtype (bf16 recommended: the op is
           HBM-bandwidth bound).  Output has the same dtype as x_all.
    w1:    (C, C)    torch Linear weight of mlp1 (out_features, in_features)
    w2:    (K*C, C)  torch Linear weight of mlp2 (out_features, in_features)
    returns: (B, N, C)
    """
    b, k, n, c = x_all.shape
    # Parameter plumbing (plain JAX glue): pre-transpose so every in-kernel
    # matmul is `x @ W`; keep the tiny weights in f32 for precision.
    w1t = jnp.asarray(w1, jnp.float32).T                  # (C, C)
    w2cat = jnp.asarray(w2, jnp.float32).T                # (C, K*C)

    io_bytes = jnp.dtype(x_all.dtype).itemsize
    x_bpb = k * n * c * io_bytes                          # x bytes / batch elem
    o_bpb = n * c * io_bytes                              # out bytes / batch elem
    w_bytes = (c * c + c * k * c) * 4

    # Per-grid-step VMEM footprint: double-buffered x/out blocks + in-kernel
    # f32 temporaries (~2 split slices + output accumulator + slack).
    def step_bytes(bt):
        return 2 * bt * (x_bpb + o_bpb) + bt * 4 * n * c * 4

    budget = 44 * 2**20          # headroom under v7x's 64 MiB physical VMEM
    divisors = [d for d in range(min(b, 16), 0, -1) if b % d == 0]
    cands = [d for d in divisors if step_bytes(d) + 2 * w_bytes <= budget] or [1]
    # Prefer >= 2 grid steps (megacore load balance on v7x), then the largest
    # batch tile (amortizes MXU pushes and the ~0.35 us per-step overhead).
    multi = [d for d in cands if (b // d) >= 2]
    bt = (multi or cands)[0]
    # TODO(synk): if even bt == 1 exceeds the VMEM budget (huge N), switch to
    # a two-phase N-tiled pipeline (accumulate `a` over N chunks, then
    # re-stream N chunks for the weighted sum).

    vmem_limit = int(min(56 * 2**20,
                         max(step_bytes(bt) + 2 * w_bytes + (2 << 20),
                             32 * 2**20)))

    kernel = functools.partial(_split_attention_kernel, k=k, c=c)
    return pl.pallas_call(
        kernel,
        out_shape=jax.ShapeDtypeStruct((b, n, c), x_all.dtype),
        grid_spec=pltpu.PrefetchScalarGridSpec(
            num_scalar_prefetch=0,
            grid=(b // bt,),
            in_specs=[
                pl.BlockSpec((bt, k, n, c), lambda bi: (bi, 0, 0, 0)),
                pl.BlockSpec((c, c), lambda bi: (0, 0)),
                pl.BlockSpec((c, k * c), lambda bi: (0, 0)),
            ],
            out_specs=pl.BlockSpec((bt, n, c), lambda bi: (bi, 0, 0)),
        ),
        compiler_params=pltpu.CompilerParams(
            dimension_semantics=("parallel",),
            vmem_limit_bytes=vmem_limit),
    )(x_all, w1t, w2cat)


def split_attention_ref(x_all, w1, w2):
    # Pure-JAX reference mirroring the PyTorch forward exactly (bias=False).
    b, k, n, c = x_all.shape
    a = jnp.sum(jnp.sum(x_all, axis=1), axis=1)                  # (B, C)
    h = jax.nn.gelu(a @ w1.T, approximate=False)
    hat = (h @ w2.T).reshape(b, k, c)
    bar = jax.nn.softmax(hat, axis=1)
    return jnp.sum(bar[:, :, None, :] * x_all, axis=1)           # (B, N, C)


if __name__ == "__main__":
    key = jax.random.PRNGKey(0)
    # Small shapes; C is a multiple of 128 so the last dim is lane-dense
    # (unmasked vst) and B > B_TILE so the batched-MLP + multi-step grid path
    # is exercised.
    B, K, N, C = 4, 3, 16, 128
    kx, k1, k2 = jax.random.split(key, 3)

    x_f32 = jax.random.normal(kx, (B, K, N, C), dtype=jnp.float32)
    x_all = x_f32.astype(jnp.bfloat16)        # bf16 I/O: halves HBM traffic
    # Deterministic "Linear" weights (torch layout: (out_features, in_features))
    bound = 1.0 / (C ** 0.5)
    w1 = jax.random.uniform(k1, (C, C), jnp.float32, -bound, bound)
    w2 = jax.random.uniform(k2, (K * C, C), jnp.float32, -bound, bound)

    out = split_attention(x_all, w1, w2)
    out = jax.block_until_ready(out)

    # f32 reference evaluated on the same (bf16-quantized) inputs.
    ref = split_attention_ref(x_all.astype(jnp.float32), w1, w2)
    assert out.shape == (B, N, C)
    assert out.dtype == x_all.dtype
    max_err = float(jnp.max(jnp.abs(out.astype(jnp.float32) - ref)))
    assert max_err < 5e-2, max_err
    print("KERNEL_OK")
</pallas_src>

<mosaic_0001>
module attributes {stable_mosaic.version = 11 : i64} {
  func.func @_split_attention_kernel(%arg0: i32, %arg1: memref<2x3x16x128xbf16, #tpu.memory_space<vmem>>, %arg2: memref<128x128xf32, #tpu.memory_space<vmem>>, %arg3: memref<128x384xf32, #tpu.memory_space<vmem>>, %arg4: memref<2x16x128xbf16, #tpu.memory_space<vmem>>) attributes {dimension_semantics = [#tpu.dimension_semantics<parallel>], iteration_bounds = array<i64: 2>, scalar_prefetch = 0 : i64, scratch_operands = 0 : i64, tpu.core_type = #tpu.core_type<tc>, window_params = [{transform_indices = @transform_0, window_bounds = array<i64: 2, 3, 16, 128>}, {pipeline_mode = #tpu.pipeline_mode<synchronous>, transform_indices = @transform_1, window_bounds = array<i64: 128, 128>}, {pipeline_mode = #tpu.pipeline_mode<synchronous>, transform_indices = @transform_2, window_bounds = array<i64: 128, 384>}, {transform_indices = @transform_3, window_bounds = array<i64: 2, 16, 128>}]} {
    %c0 = arith.constant 0 : index
    %c0_0 = arith.constant 0 : index
    %c0_1 = arith.constant 0 : index
    %c0_2 = arith.constant 0 : index
    %0 = vector.load %arg1[%c0, %c0_0, %c0_1, %c0_2] : memref<2x3x16x128xbf16, #tpu.memory_space<vmem>>, vector<2x1x16x128xbf16>
    %1 = vector.shape_cast %0 : vector<2x1x16x128xbf16> to vector<2x16x128xbf16>
    %2 = arith.extf %1 : vector<2x16x128xbf16> to vector<2x16x128xf32>
    %cst = arith.constant dense<0.000000e+00> : vector<2x128xf32>
    %3 = vector.multi_reduction <add>, %2, %cst [1] : vector<2x16x128xf32> to vector<2x128xf32>
    %c0_3 = arith.constant 0 : index
    %c1 = arith.constant 1 : index
    %c0_4 = arith.constant 0 : index
    %c0_5 = arith.constant 0 : index
    %4 = vector.load %arg1[%c0_3, %c1, %c0_4, %c0_5] : memref<2x3x16x128xbf16, #tpu.memory_space<vmem>>, vector<2x1x16x128xbf16>
    %5 = vector.shape_cast %4 : vector<2x1x16x128xbf16> to vector<2x16x128xbf16>
    %6 = arith.extf %5 : vector<2x16x128xbf16> to vector<2x16x128xf32>
    %cst_6 = arith.constant dense<0.000000e+00> : vector<2x128xf32>
    %7 = vector.multi_reduction <add>, %6, %cst_6 [1] : vector<2x16x128xf32> to vector<2x128xf32>
    %8 = arith.addf %3, %7 : vector<2x128xf32>
    %c0_7 = arith.constant 0 : index
    %c2 = arith.constant 2 : index
    %c0_8 = arith.constant 0 : index
    %c0_9 = arith.constant 0 : index
    %9 = vector.load %arg1[%c0_7, %c2, %c0_8, %c0_9] : memref<2x3x16x128xbf16, #tpu.memory_space<vmem>>, vector<2x1x16x128xbf16>
    %10 = vector.shape_cast %9 : vector<2x1x16x128xbf16> to vector<2x16x128xbf16>
    %11 = arith.extf %10 : vector<2x16x128xbf16> to vector<2x16x128xf32>
    %cst_10 = arith.constant dense<0.000000e+00> : vector<2x128xf32>
    %12 = vector.multi_reduction <add>, %11, %cst_10 [1] : vector<2x16x128xf32> to vector<2x128xf32>
    %13 = arith.addf %8, %12 : vector<2x128xf32>
    %c0_11 = arith.constant 0 : index
    %c0_12 = arith.constant 0 : index
    %14 = vector.load %arg2[%c0_11, %c0_12] : memref<128x128xf32, #tpu.memory_space<vmem>>, vector<128x128xf32>
    %cst_13 = arith.constant dense<0.000000e+00> : vector<2x128xf32>
    %15 = tpu.matmul %13, %14, %cst_13 {dimension_numbers = #tpu.dot_dimension_numbers<[1], [0], [0], [1], [0, 0, 1, 1], [], []>} : vector<2x128xf32>, vector<128x128xf32>, vector<2x128xf32> -> vector<2x128xf32>
    %cst_14 = arith.constant 5.000000e-01 : f32
    %16 = vector.broadcast %cst_14 : f32 to vector<2x128xf32>
    %17 = arith.mulf %16, %15 : vector<2x128xf32>
    %cst_15 = arith.constant 0.707106769 : f32
    %18 = vector.broadcast %cst_15 : f32 to vector<2x128xf32>
    %19 = arith.mulf %15, %18 : vector<2x128xf32>
    %20 = math.absf %19 : vector<2x128xf32>
    %cst_16 = arith.constant 0.327591091 : f32
    %21 = vector.broadcast %cst_16 : f32 to vector<2x128xf32>
    %22 = arith.mulf %21, %20 : vector<2x128xf32>
    %cst_17 = arith.constant 1.000000e+00 : f32
    %23 = vector.broadcast %cst_17 : f32 to vector<2x128xf32>
    %24 = arith.addf %23, %22 : vector<2x128xf32>
    %25 = tpu.reciprocal %24 {approx = true} : vector<2x128xf32> -> vector<2x128xf32>
    %cst_18 = arith.constant 1.06140542 : f32
    %26 = vector.broadcast %cst_18 : f32 to vector<2x128xf32>
    %27 = arith.mulf %26, %25 : vector<2x128xf32>
    %cst_19 = arith.constant -1.45315206 : f32
    %28 = vector.broadcast %cst_19 : f32 to vector<2x128xf32>
    %29 = arith.addf %27, %28 : vector<2x128xf32>
    %30 = arith.mulf %29, %25 : vector<2x128xf32>
    %cst_20 = arith.constant 1.42141378 : f32
    %31 = vector.broadcast %cst_20 : f32 to vector<2x128xf32>
    %32 = arith.addf %30, %31 : vector<2x128xf32>
    %33 = arith.mulf %32, %25 : vector<2x128xf32>
    %cst_21 = arith.constant -0.284496725 : f32
    %34 = vector.broadcast %cst_21 : f32 to vector<2x128xf32>
    %35 = arith.addf %33, %34 : vector<2x128xf32>
    %36 = arith.mulf %35, %25 : vector<2x128xf32>
    %cst_22 = arith.constant 0.254829586 : f32
    %37 = vector.broadcast %cst_22 : f32 to vector<2x128xf32>
    %38 = arith.addf %36, %37 : vector<2x128xf32>
    %39 = arith.mulf %38, %25 : vector<2x128xf32>
    %cst_23 = arith.constant 0.000000e+00 : f32
    %40 = vector.broadcast %cst_23 : f32 to vector<2x128xf32>
    %41 = arith.subf %40, %20 : vector<2x128xf32>
    %42 = arith.mulf %41, %20 : vector<2x128xf32>
    %43 = math.exp %42 : vector<2x128xf32>
    %44 = arith.mulf %39, %43 : vector<2x128xf32>
    %cst_24 = arith.constant 1.000000e+00 : f32
    %45 = vector.broadcast %cst_24 : f32 to vector<2x128xf32>
    %46 = arith.subf %45, %44 : vector<2x128xf32>
    %cst_25 = arith.constant 0.000000e+00 : f32
    %47 = vector.broadcast %cst_25 : f32 to vector<2x128xf32>
    %48 = arith.cmpf olt, %19, %47 : vector<2x128xf32>
    %cst_26 = arith.constant 0.000000e+00 : f32
    %49 = vector.broadcast %cst_26 : f32 to vector<2x128xf32>
    %50 = arith.subf %49, %46 : vector<2x128xf32>
    %51 = arith.select %48, %50, %46 : vector<2x128xi1>, vector<2x128xf32>
    %cst_27 = arith.constant 1.000000e+00 : f32
    %52 = vector.broadcast %cst_27 : f32 to vector<2x128xf32>
    %53 = arith.addf %52, %51 : vector<2x128xf32>
    %54 = arith.mulf %17, %53 : vector<2x128xf32>
    %c0_28 = arith.constant 0 : index
    %c0_29 = arith.constant 0 : index
    %55 = vector.load %arg3[%c0_28, %c0_29] : memref<128x384xf32, #tpu.memory_space<vmem>>, vector<128x384xf32>
    %cst_30 = arith.constant dense<0.000000e+00> : vector<2x384xf32>
    %56 = tpu.matmul %54, %55, %cst_30 {dimension_numbers = #tpu.dot_dimension_numbers<[1], [0], [0], [1], [0, 0, 1, 1], [], []>} : vector<2x128xf32>, vector<128x384xf32>, vector<2x384xf32> -> vector<2x384xf32>
    %57 = vector.extract_strided_slice %56 {offsets = [0, 0], sizes = [2, 128], strides = [1, 1]} : vector<2x384xf32> to vector<2x128xf32>
    %58 = vector.extract_strided_slice %56 {offsets = [0, 128], sizes = [2, 128], strides = [1, 1]} : vector<2x384xf32> to vector<2x128xf32>
    %59 = vector.extract_strided_slice %56 {offsets = [0, 256], sizes = [2, 128], strides = [1, 1]} : vector<2x384xf32> to vector<2x128xf32>
    %60 = arith.maximumf %57, %58 : vector<2x128xf32>
    %61 = arith.maximumf %60, %59 : vector<2x128xf32>
    %62 = arith.subf %57, %61 : vector<2x128xf32>
    %63 = math.exp %62 : vector<2x128xf32>
    %64 = arith.subf %58, %61 : vector<2x128xf32>
    %65 = math.exp %64 : vector<2x128xf32>
    %66 = arith.subf %59, %61 : vector<2x128xf32>
    %67 = math.exp %66 : vector<2x128xf32>
    %68 = arith.addf %63, %65 : vector<2x128xf32>
    %69 = arith.addf %68, %67 : vector<2x128xf32>
    %70 = tpu.reciprocal %69 {approx = true} : vector<2x128xf32> -> vector<2x128xf32>
    %71 = arith.mulf %63, %70 : vector<2x128xf32>
    %72 = vector.shape_cast %71 : vector<2x128xf32> to vector<2x1x128xf32>
    %73 = arith.mulf %65, %70 : vector<2x128xf32>
    %74 = vector.shape_cast %73 : vector<2x128xf32> to vector<2x1x128xf32>
    %75 = arith.mulf %67, %70 : vector<2x128xf32>
    %76 = vector.shape_cast %75 : vector<2x128xf32> to vector<2x1x128xf32>
    %c0_31 = arith.constant 0 : index
    %c0_32 = arith.constant 0 : index
    %c0_33 = arith.constant 0 : index
    %c0_34 = arith.constant 0 : index
    %77 = vector.load %arg1[%c0_31, %c0_32, %c0_33, %c0_34] : memref<2x3x16x128xbf16, #tpu.memory_space<vmem>>, vector<2x1x16x128xbf16>
    %78 = vector.shape_cast %77 : vector<2x1x16x128xbf16> to vector<2x16x128xbf16>
    %79 = arith.extf %78 : vector<2x16x128xbf16> to vector<2x16x128xf32>
    %80 = vector.broadcast %72 : vector<2x1x128xf32> to vector<2x16x128xf32>
    %81 = arith.mulf %80, %79 : vector<2x16x128xf32>
    %c0_35 = arith.constant 0 : index
    %c1_36 = arith.constant 1 : index
    %c0_37 = arith.constant 0 : index
    %c0_38 = arith.constant 0 : index
    %82 = vector.load %arg1[%c0_35, %c1_36, %c0_37, %c0_38] : memref<2x3x16x128xbf16, #tpu.memory_space<vmem>>, vector<2x1x16x128xbf16>
    %83 = vector.shape_cast %82 : vector<2x1x16x128xbf16> to vector<2x16x128xbf16>
    %84 = arith.extf %83 : vector<2x16x128xbf16> to vector<2x16x128xf32>
    %85 = vector.broadcast %74 : vector<2x1x128xf32> to vector<2x16x128xf32>
    %86 = arith.mulf %85, %84 : vector<2x16x128xf32>
    %87 = arith.addf %81, %86 : vector<2x16x128xf32>
    %c0_39 = arith.constant 0 : index
    %c2_40 = arith.constant 2 : index
    %c0_41 = arith.constant 0 : index
    %c0_42 = arith.constant 0 : index
    %88 = vector.load %arg1[%c0_39, %c2_40, %c0_41, %c0_42] : memref<2x3x16x128xbf16, #tpu.memory_space<vmem>>, vector<2x1x16x128xbf16>
    %89 = vector.shape_cast %88 : vector<2x1x16x128xbf16> to vector<2x16x128xbf16>
    %90 = arith.extf %89 : vector<2x16x128xbf16> to vector<2x16x128xf32>
    %91 = vector.broadcast %76 : vector<2x1x128xf32> to vector<2x16x128xf32>
    %92 = arith.mulf %91, %90 : vector<2x16x128xf32>
    %93 = arith.addf %87, %92 : vector<2x16x128xf32>
    %94 = arith.truncf %93 : vector<2x16x128xf32> to vector<2x16x128xbf16>
    %c0_43 = arith.constant 0 : index
    %c0_44 = arith.constant 0 : index
    %c0_45 = arith.constant 0 : index
    %95 = vector.load %arg4[%c0_43, %c0_44, %c0_45] : memref<2x16x128xbf16, #tpu.memory_space<vmem>>, vector<2x16x128xbf16>
    tpu.vector_store %arg4[%c0_43, %c0_44, %c0_45], %94 {strides = array<i32>} : memref<2x16x128xbf16, #tpu.memory_space<vmem>>, vector<2x16x128xbf16>,
    return
  }
  func.func @transform_0(%arg0: i32) -> (i32, i32, i32, i32) {
    %c0_i32 = arith.constant 0 : i32
    %c0_i32_0 = arith.constant 0 : i32
    %c0_i32_1 = arith.constant 0 : i32
    %c0_i32_2 = arith.constant 0 : i32
    return %arg0, %c0_i32, %c0_i32_0, %c0_i32_1 : i32, i32, i32, i32
  }
  func.func @transform_1(%arg0: i32) -> (i32, i32) {
    %c0_i32 = arith.constant 0 : i32
    %c0_i32_0 = arith.constant 0 : i32
    %c0_i32_1 = arith.constant 0 : i32
    return %c0_i32, %c0_i32_0 : i32, i32
  }
  func.func @transform_2(%arg0: i32) -> (i32, i32) {
    %c0_i32 = arith.constant 0 : i32
    %c0_i32_0 = arith.constant 0 : i32
    %c0_i32_1 = arith.constant 0 : i32
    return %c0_i32, %c0_i32_0 : i32, i32
  }
  func.func @transform_3(%arg0: i32) -> (i32, i32, i32) {
    %c0_i32 = arith.constant 0 : i32
    %c0_i32_0 = arith.constant 0 : i32
    %c0_i32_1 = arith.constant 0 : i32
    return %arg0, %c0_i32, %c0_i32_0 : i32, i32, i32
  }
}

</mosaic_0001>

<bundles_post_ra>
// kernel: tpu_custom_call.1
= control target key start
LH: loop header
LB: loop body
LE: loop exit
PB: predicated region body
PF: predicated region fallthrough
CT: control target
= control target key end

     0   :  { %8 = vsyncpa [#allocation3], 0  ;;  %s1746_s0 = inlined_call_operand.hbm [shape: bf16[4,3,16,128], index: 0, kind: input, shape index: {}]   ;;  %s1747_s1 = inlined_call_operand.hbm [shape: f32[128,128], index: 1, kind: input, shape index: {}]   ;;  %s1748_s2 = inlined_call_operand.hbm [shape: f32[128,384], index: 2, kind: input, shape index: {}]   ;;  %s1749_s3 = inlined_call_operand.hbm [shape: bf16[4,16,128], index: 3, kind: output, shape index: {}]  }
   0x1   :  { %10 = vsyncpa [#allocation3 + $0x1], 0 }
   0x2   :  { %11 = vsyncpa [#allocation6], 0 }
   0x3   :  { %12 = vsyncpa [#allocation4], 0 }
   0x4   :  { %14 = vsyncpa [#allocation4 + $0x1], 0  ;;  %s1410_s12 = smov 0   ;;  %s1412_s13 = smov 0  }
   0x5   :  { %s1414_s14 = smov 0   ;;  %s1416_s15 = smov 0  }
   0x6 LB: > { %s1431_s16 = sadd.s32 4294967295, %s1372_s15   ;;  %s862_s17 = sadd.s32 4294967294, %s1372_s15   ;;  %s1372_s15 = sphi %s1416_s15, %s1769_s15   ;;  %s1368_s14 = sphi %s1414_s14, %s1768_s14   ;;  %s1364_s13 = sphi %s1412_s13, %s1767_s13   ;;  %s1360_s12 = sphi %s1410_s12, %s1766_s12  }
   0x7   : > { %p40_p0 = scmp.ne.s32.totalorder %s1364_s13, %s1360_s12  ;;  %p1750_p1 = scmp.eq.s32.totalorder %s1431_s16, 0 }
   0x8   : > { %p112_p3 = scmp.eq.s32.totalorder %s862_s17, 1  ;;  %p863_p5 = scmp.ge.s32.totalorder %s1372_s15, 1 }
   0x9   : > { %p1440_p4 = por %p1750_p1, %p40_p0  ;;  %p119_p7 = scmp.lt.s32.totalorder %s1372_s15, 3 }
   0xa   : > { %p1445_p6 = por %p112_p3, %p40_p0  ;;  %s1374_s21 = smov [#allocation5]  }
   0xb   : > { %s1753_s18 = scalar_select %p1440_p4, 1, 0 }
   0xc   : > { %s1754_s19 = scalar_select %p1445_p6, 1, 0 }
   0xd   : > { %p1450_p8 = pnand %p863_p5, %p119_p7  ;;  %s131_s22 = sshll.u32 %s1374_s21, 4  ;;  %s1454_s22 = int_to_ptr.vmem [resolvable:$true] %s131_s22 }
   0xe   : > { %s1375_s24 = smov [#allocation7]   ;;  %s1216_s28 = scalar_lea.hbm %s1747_s1, 2048 }
   0xf   : > { %p1137_p9 = pneg %p1450_p8  ;;  %s144_s25 = sshll.u32 %s1375_s24, 4  ;;  %s1465_s25 = int_to_ptr.vmem [resolvable:$true] %s144_s25 }
  0x10   : > { %p1217_p12 = scmp.ne.s32.totalorder %s1747_s1, %s1216_s28  ;;  %p1223_p5 = scmp.lt.u32.totalorder %s1216_s28, %s1747_s1 }
  0x11   : > { %p1461_p11 = pnand %p1137_p9, %p1750_p1 }
  0x13   : > { %p1218_p13 = pneg %p1461_p11 }
  0x15   : > { %p1219_p0 = pnand %p1218_p13, %p1217_p12 }
  0x17   : > { %p1220_p3 = pneg %p1219_p0 }
  0x19   : > { %p1225_p7 = pnand %p1223_p5, %p1220_p3 }
  0x1b   : > { %1228 = shalt.err (!%p1225_p7)
}
  0x1c   : > { %s1229_s6 = scalar_lea.vmem %s1454_s22, 2048  ;;  %p1237_p2 = scmp.lt.s32.totalorder %s1454_s22, %s1454_s22 }
  0x1d   : > { %p1230_p9 = scmp.ne.s32.totalorder %s1454_s22, %s1229_s6  ;;  %p1238_p12 = scmp.lt.s32.totalorder %s1229_s6, %s1229_s6 }
  0x1f   : > { %p1232_p10 = pnand %p1230_p9, %p1218_p13  ;;  %p1239_p0 = por %p1238_p12, %p1237_p2 }
  0x21   : > { %p1233_p1 = pneg %p1232_p10 }
  0x23   : > { %p1240_p6 = pnand %p1239_p0, %p1233_p1 }
  0x25   : > { %1243 = shalt.err (!%p1240_p6)
}
  0x26   : > { %s1376_s7 = smov 128   ;;  %s1377_s8 = smov 8  }
  0x27   : > { %1140 = dma.hbm_to_vmem [thread:$0]  (!%p1461_p11), %s1747_s1, 2048, %s1454_s22, [#allocation6], %s1376_s7, %s1376_s7, %s1377_s8  }
  0x28   : > { %s1244_s21 = scalar_lea.hbm %s1748_s2, 6144 }
  0x29   : > { %p1245_p2 = scmp.ne.s32.totalorder %s1748_s2, %s1244_s21  ;;  %p1251_p10 = scmp.lt.u32.totalorder %s1244_s21, %s1748_s2 }
  0x2b   : > { %p1247_p1 = pnand %p1245_p2, %p1218_p13 }
  0x2d   : > { %p1248_p6 = pneg %p1247_p1 }
  0x2f   : > { %p1253_p3 = pnand %p1251_p10, %p1248_p6 }
  0x31   : > { %1256 = shalt.err (!%p1253_p3)
}
  0x32   : > { %s1257_s22 = scalar_lea.vmem %s1465_s25, 6144  ;;  %p1265_p12 = scmp.lt.s32.totalorder %s1465_s25, %s1465_s25 }
  0x33   : > { %p1258_p5 = scmp.ne.s32.totalorder %s1465_s25, %s1257_s22  ;;  %p1266_p0 = scmp.lt.s32.totalorder %s1257_s22, %s1257_s22 }
  0x35   : > { %p1260_p7 = pnand %p1258_p5, %p1218_p13  ;;  %p1267_p2 = por %p1266_p0, %p1265_p12 }
  0x37   : > { %p1261_p9 = pneg %p1260_p7 }
  0x39   : > { %p1268_p1 = pnand %p1267_p2, %p1261_p9 }
  0x3b   : > { %1271 = shalt.err (!%p1268_p1)
}
  0x3c   : > { %s1378_s29 = smov 384   ;;  %s1379_s30 = smov 24  }
  0x3d   : > { %1143 = dma.hbm_to_vmem [thread:$0]  (!%p1461_p11), %s1748_s2, 6144, %s1465_s25, [#allocation6], %s1378_s29, %s1378_s29, %s1379_s30  }
  0x3e   : > { %s1520_s6 = sadd.s32 1, %s1372_s15   ;;  %s27_s8 = sadd.s32 1, %s1368_s14 }
  0x3f   : > { %s24_s7 = ssub.s32 %s1372_s15, %s1520_s6  ;;  %p34_p6 = scmp.ne.s32.totalorder %s1368_s14, %s1364_s13 }
  0x40   : > { %p25_p13 = scmp.eq.s32.totalorder %s24_s7, 0  ;;  %p35_p10 = scmp.eq.s32.totalorder %s1372_s15, 0 }
  0x41   : > { %p1757_p5 = scmp.eq.s32.totalorder %s1431_s16, 1  ;;  %p1154_p9 = scmp.lt.s32.totalorder %s1372_s15, 2 }
  0x42   : > { %s1529_s9 = scalar_select %p25_p13, %s1368_s14, %s27_s8  }
  0x43   : > { %p36_p3 = por %p35_p10, %p34_p6  ;;  %p1533_p7 = por %p1757_p5, %p34_p6 }
  0x44   : > { %s158_s23 = sand.u32 1, %s1368_s14   ;;  %s1123_s25 = smul.u32 768, %s1372_s15 }
  0x45   : > { %s1758_s10 = scalar_select %p1533_p7, 1, 0 }
  0x46   : > { %s1122_s11 = smul.u32 48, %s158_s23  ;;  %p1540_p11 = pnand %p1154_p9, %p36_p3 }
  0x47   : > { %s1547_s26 = scalar_lea.hbm %s1746_s0, %s1123_s25  ;;  %s1551_s22 = scalar_lea.sflag [#allocation3], %s158_s23 }
  0x48   : > { %s162_s27 = scalar_lea.vmem [#allocation2], %s1122_s11  ;;  %s1272_s29 = scalar_lea.hbm %s1547_s26, 768 }
  0x49   : > { %s170_s28 = sshll.u32 %s162_s27, 4  ;;  %p1273_p12 = scmp.ne.s32.totalorder %s1547_s26, %s1272_s29  ;;  %s1549_s28 = int_to_ptr.vmem [resolvable:$true] %s170_s28 }
  0x4a   : > { %p1274_p0 = pneg %p1540_p11  ;;  %s1277_s5 = scalar_lea.hbm %s1746_s0, 1536 }
  0x4b   : > { %p1278_p13 = scmp.lt.u32.totalorder %s1547_s26, %s1746_s0  ;;  %p1279_p6 = scmp.lt.u32.totalorder %s1277_s5, %s1272_s29 }
  0x4c   : > { %p1275_p2 = pnand %p1274_p0, %p1273_p12  ;;  %p1281_p3 = scmp.lt.u32.totalorder %s1272_s29, %s1547_s26 }
  0x4d   : > { %p1280_p10 = por %p1279_p6, %p1278_p13 }
  0x4e   : > { %p1276_p1 = pneg %p1275_p2 }
  0x4f   : > { %p1282_p5 = por %p1281_p3, %p1280_p10 }
  0x51   : > { %p1283_p9 = pnand %p1282_p5, %p1276_p1 }
  0x53   : > { %1286 = shalt.err (!%p1283_p9)
}
  0x54   : > { %s1287_s23 = scalar_lea.vmem %s1549_s28, 768  ;;  %s1380_s11 = smov [#allocation2]  }
  0x55   : > { %p1288_p12 = scmp.ne.s32.totalorder %s1549_s28, %s1287_s23  ;;  %s1292_s25 = sshll.u32 %s1380_s11, 4  ;;  %s1293_s25 = int_to_ptr.vmem [resolvable:$false] %s1292_s25 }
  0x56   : > { %s1294_s21 = scalar_lea.vmem %s1293_s25, 1536  ;;  %p1295_p4 = scmp.lt.s32.totalorder %s1549_s28, %s1293_s25 }
  0x57   : > { %p1290_p2 = pnand %p1288_p12, %p1274_p0  ;;  %p1296_p13 = scmp.lt.s32.totalorder %s1294_s21, %s1287_s23 }
  0x59   : > { %p1291_p7 = pneg %p1290_p2  ;;  %p1297_p6 = por %p1296_p13, %p1295_p4 }
  0x5b   : > { %p1298_p10 = pnand %p1297_p6, %p1291_p7 }
  0x5d   : > { %1301 = shalt.err (!%p1298_p10)
}
  0x5e   : > { %s1381_s24 = smov 64   ;;  %s1382_s27 = smov 4  }
  0x5f   : > { %1147 = dma.hbm_to_vmem [thread:$0]  (!%p1540_p11), %s1547_s26, 768, %s1549_s28, %s1551_s22, %s1381_s24, %s1381_s24, %s1382_s27  }
  0x60   : > { %182 = sbr.rel (%p1450_p8) target bundleno = 682 (0x2aa), region = 32  ;;  %s1582_s29 = sand.u32 (!%p1450_p8), 1, %s1364_s13  }
  0x61   : > { %s1124_s30 = smul.u32 (!%p1450_p8), 48, %s1582_s29  ;;  %s185_s4 = scalar_lea.sflag (!%p1450_p8), [#allocation3], %s1582_s29 }
  0x62   : > { %p1760_p4 = scmp.ne.s32.totalorder (!%p1450_p8), %s1753_s18, 0 }
  0x63   : > { %s1586_s5 = scalar_lea.vmem (!%p1450_p8), [#allocation2], %s1124_s30 }
  0x67   : > { %1347 = dma.done.wait (%p1760_p4), %s185_s4, 768  }
  0x68   : > { %1349 = vsyncadd (%p1760_p4), %s185_s4, 4294966528  ;;  %p1761_p7 = scmp.eq.s32.totalorder %s1431_s16, 0 }
  0x6a   : > { %1351 = dma.done.wait (%p1761_p7), [#allocation6], 8192   ;;  %p1762_p8 = pmov %p1761_p7 }
  0x6b   : > { %v1383_v0 = vmov 0.0|0.0   ;;  %vm1384_vm0 = vmmov 0   ;;  %v1385_v1 = vmov 0.0   ;;  %v293_v2 = vld [vmem:[#allocation5] sm:$0xff]  ;;  %v294_v3 = vld [vmem:[#allocation5 + $0x8] sm:$0xff]  ;;  %v295_v4 = vld [vmem:[#allocation5 + $0x10] sm:$0xff] }
  0x6c   : > { %1353 = vsyncadd (%p1762_p8), [#allocation6], 4294959104  ;;  %1042 = vmatprep.subr.bf16.mxu0 %v1383_v0  ;;  %1004 = vmatprep.mubr.msk.f32.mxu0 %vm1384_vm0, %v1385_v1  ;;  %v1043_v5 = vpack.c.bf16 %v294_v3, %v293_v2  ;;  %v296_v6 = vld [vmem:[#allocation5 + $0x18] sm:$0xff]  ;;  %v297_v8 = vld [vmem:[#allocation5 + $0x20] sm:$0xff]  ;;  %vm311_vm1 = vcmask 1041409   ;;  %s873_s18 = sshll.u32 %s1582_s29, 4 }
  0x6d   : > { %522 = vmatprep.mubr.f32.mxu1 %v1385_v1  ;;  %v1046_v7 = vpack.c.bf16 %v296_v6, %v295_v4  ;;  %v298_v9 = vld [vmem:[#allocation5 + $0x28] sm:$0xff]  ;;  %v1602_v10 = vld [vmem:[%s1586_s5] sm:$0xff]   ;;  %v1617_v18 = vld [vmem:[%s1586_s5 + $0x10] sm:$0xff]   ;;  %s897_s20 = sshll.u32 %s1431_s16, 8  ;;  %s218_s17 = scalar_lea.vmem [#allocation8], %s873_s18 }
  0x6e   : > { %1044 = vmatpush3.bf16.msra.mxu0 %v1043_v5  ;;  %v1605_v11 = vld [vmem:[%s1586_s5 + $0x18] sm:$0xff]   ;;  %v1049_v12 = vpack.c.bf16 %v298_v9, %v297_v8  ;;  %v900_v13 = vunpack.c.l.bf16 %v1602_v10  ;;  %v901_v14 = vunpack.c.h.bf16 %v1602_v10  ;;  %v1611_v16 = vld [vmem:[%s1586_s5 + $0x8] sm:$0xff]   ;;  %v1614_v17 = vld [vmem:[%s1586_s5 + $0x20] sm:$0xff]   ;;  %v916_v28 = vunpack.c.l.bf16 %v1617_v18  ;;  %s770_s26 = sshll.u32 %s218_s17, 4  ;;  %s1700_s7 = scalar_lea.hbm %s1749_s3, %s897_s20  ;;  %s1702_s26 = int_to_ptr.vmem [resolvable:$true] %s770_s26 }
  0x6f   : > { %1045 = vmatprep.subr.bf16.mxu0 %v1383_v0  ;;  %v904_v15 = vunpack.c.l.bf16 %v1605_v11  ;;  %v905_v19 = vunpack.c.h.bf16 %v1605_v11  ;;  %v908_v20 = vunpack.c.l.bf16 %v1611_v16  ;;  %v909_v21 = vunpack.c.h.bf16 %v1611_v16  ;;  %v1624_v23 = vld [vmem:[%s1586_s5 + $0x28] sm:$0xff]   ;;  %v299_v24 = vld [vmem:[#allocation5 + $0x30] sm:$0xff]  ;;  %v301_v41 = vld [vmem:[#allocation5 + $0x40] sm:$0xff]  ;;  %s756_s16 = scalar_lea.sflag [#allocation4], %s1582_s29  ;;  %s1302_s8 = scalar_lea.vmem %s1702_s26, 256 }
  0x70   : > { %v912_v22 = vunpack.c.l.bf16 %v1614_v17  ;;  %v300_v25 = vld [vmem:[#allocation5 + $0x38] sm:$0xff]  ;;  %v229_v26 = vadd.f32 %v901_v14, %v900_v13  ;;  %v913_v27 = vunpack.c.h.bf16 %v1614_v17  ;;  %v917_v29 = vunpack.c.h.bf16 %v1617_v18  ;;  %v302_v42 = vld [vmem:[#allocation5 + $0x48] sm:$0xff]  ;;  %v303_v56 = vld [vmem:[#allocation5 + $0x50] sm:$0xff]  ;;  %p1303_p11 = scmp.ne.s32.totalorder %s1702_s26, %s1302_s8  ;;  %p1763_p0 = scmp.ne.s32.totalorder %s1758_s10, 0 }
  0x71   : > { %v236_v30 = vadd.f32 %v905_v19, %v904_v15  ;;  %v252_v31 = vadd.f32 %v909_v21, %v908_v20  ;;  %v920_v32 = vunpack.c.l.bf16 %v1624_v23  ;;  %v921_v33 = vunpack.c.h.bf16 %v1624_v23  ;;  %v304_v57 = vld [vmem:[#allocation5 + $0x58] sm:$0xff]  ;;  %v305_v9 = vld [vmem:[#allocation5 + $0x60] sm:$0xff]  ;;  %s1387_s23 = smov [#allocation8]  }
  0x72   : > { %1047 = vmatpush3.bf16.msra.mxu0 %v1046_v7  ;;  %v230_v34 = vrot.slane %v229_v26, 4  ;;  %v259_v35 = vadd.f32 %v913_v27, %v912_v22  ;;  %v277_v36 = vadd.f32 %v917_v29, %v916_v28  ;;  %v1052_v37 = vpack.c.bf16 %v300_v25, %v299_v24  ;;  %p1304_p1 = pnand %p1303_p11, %p1763_p0  ;;  %s1306_s11 = sshll.u32 %s1387_s23, 4  ;;  %s1307_s11 = int_to_ptr.vmem [resolvable:$false] %s1306_s11 }
  0x73   : > { %1048 = vmatprep.subr.bf16.mxu0 %v1383_v0  ;;  %v237_v38 = vrot.slane %v236_v30, 4  ;;  %v253_v39 = vrot.slane %v252_v31, 4  ;;  %v284_v40 = vadd.f32 %v921_v33, %v920_v32  ;;  %v1055_v52 = vpack.c.bf16 %v302_v42, %v301_v41  ;;  %v308_v41 = vld [vmem:[#allocation5 + $0x78] sm:$0xff]  ;;  %s1308_s25 = scalar_lea.vmem %s1307_s11, 512  ;;  %p1309_p5 = scmp.lt.s32.totalorder %s1702_s26, %s1307_s11 }
  0x74   : > { %v231_v43 = vadd.f32 %v230_v34, %v229_v26  ;;  %v260_v44 = vrot.slane %v259_v35, 4  ;;  %v278_v45 = vrot.slane %v277_v36, 4  ;;  %v1058_v5 = vpack.c.bf16 %v304_v57, %v303_v56  ;;  %v417_v56 = vld [vmem:[#allocation7 + $0x38] sm:$0xff]  ;;  %v420_v57 = vld [vmem:[#allocation7 + $0x50] sm:$0xff]  ;;  %p1305_p3 = pneg %p1304_p1  ;;  %p1310_p9 = scmp.lt.s32.totalorder %s1308_s25, %s1302_s8 }
  0x75   : > { %v238_v46 = vadd.f32 %v237_v38, %v236_v30  ;;  %v254_v47 = vadd.f32 %v253_v39, %v252_v31  ;;  %v285_v48 = vrot.slane %v284_v40, 4 }
  0x76   : > { %1050 = vmatpush3.bf16.msra.mxu0 %v1049_v12  ;;  %v232_v49 = vrot.slane %v231_v43, 2  ;;  %v261_v50 = vadd.f32 %v260_v44, %v259_v35  ;;  %v279_v51 = vadd.f32 %v278_v45, %v277_v36  ;;  %v306_v12 = vld [vmem:[#allocation5 + $0x68] sm:$0xff]  ;;  %p1311_p12 = por %p1310_p9, %p1309_p5 }
  0x77   : > { %1051 = vmatprep.subr.bf16.mxu0 %v1383_v0  ;;  %v239_v53 = vrot.slane %v238_v46, 2  ;;  %v255_v54 = vrot.slane %v254_v47, 2  ;;  %v286_v55 = vadd.f32 %v285_v48, %v284_v40  ;;  %v1061_v36 = vpack.c.bf16 %v306_v12, %v305_v9  ;;  %v307_v40 = vld [vmem:[#allocation5 + $0x70] sm:$0xff]  ;;  %v414_v48 = vld [vmem:[#allocation7 + $0x20] sm:$0xff]  ;;  %v427_v9 = vld [vmem:[#allocation7 + $0x88] sm:$0xff] }
  0x78   : > { %v233_v58 = vadd.f32 %v232_v49, %v231_v43  ;;  %v262_v59 = vrot.slane %v261_v50, 2  ;;  %v280_v60 = vrot.slane %v279_v51, 2  ;;  %v1064_v43 = vpack.c.bf16 %v308_v41, %v307_v40  ;;  %v434_v41 = vld [vmem:[#allocation7 + $0xc0] sm:$0xff]  ;;  %p1312_p2 = pnand %p1311_p12, %p1305_p3 }
  0x79   : > { %v240_v61 = vadd.f32 %v239_v53, %v238_v46  ;;  %v256_v62 = vadd.f32 %v255_v54, %v254_v47  ;;  %v287_v63 = vrot.slane %v286_v55, 2  ;;  %v411_v47 = vld [vmem:[#allocation7 + $0x8] sm:$0xff] }
  0x7a   : > { %1053 = vmatpush3.bf16.msra.mxu0 %v1052_v37  ;;  %v234_v2 = vrot.slane %v233_v58, 1  ;;  %v263_v3 = vadd.f32 %v262_v59, %v261_v50  ;;  %v281_v4 = vadd.f32 %v280_v60, %v279_v51  ;;  %v1066_v49 = vpack.c.bf16 %v414_v48, %v411_v47  ;;  %v410_v50 = vld [vmem:[#allocation7] sm:$0xff]  ;;  %v413_v51 = vld [vmem:[#allocation7 + $0x18] sm:$0xff]  ;;  %v415_v54 = vld [vmem:[#allocation7 + $0x28] sm:$0xff] }
  0x7b   : > { %1054 = vmatprep.subr.bf16.mxu0 %v1383_v0  ;;  %v241_v6 = vrot.slane %v240_v61, 1  ;;  %v257_v7 = vrot.slane %v256_v62, 1  ;;  %v288_v8 = vadd.f32 %v287_v63, %v286_v55  ;;  %v1068_v53 = vpack.c.bf16 %v413_v51, %v410_v50  ;;  %v416_v59 = vld [vmem:[#allocation7 + $0x30] sm:$0xff]  ;;  %v419_v60 = vld [vmem:[#allocation7 + $0x48] sm:$0xff]  ;;  %v441_v47 = vld [vmem:[#allocation7 + $0xf8] sm:$0xff] }
  0x7c   : > { %v235_v24 = vadd.f32 %v234_v2, %v233_v58  ;;  %v264_v25 = vrot.slane %v263_v3, 1  ;;  %v282_v26 = vrot.slane %v281_v4, 1  ;;  %1067 = vmatprep.subr.bf16.mxu1 %v1066_v49  ;;  %v1070_v58 = vpack.c.bf16 %v420_v57, %v417_v56  ;;  %v423_v2 = vld [vmem:[#allocation7 + $0x68] sm:$0xff]  ;;  %v444_v48 = vld [vmem:[#allocation7 + $0x110] sm:$0xff]  ;;  %v450_v57 = vld [vmem:[#allocation7 + $0x140] sm:$0xff] }
  0x7d   : > { %v242_v30 = vadd.f32 %v241_v6, %v240_v61  ;;  %v258_v31 = vadd.f32 %v257_v7, %v256_v62  ;;  %v289_v34 = vrot.slane %v288_v8, 1  ;;  %1069 = vmatpush1.bf16.msra.mxu1 %v1068_v53  ;;  %v418_v61 = vld [vmem:[#allocation7 + $0x40] sm:$0xff]  ;;  %v421_v62 = vld [vmem:[#allocation7 + $0x58] sm:$0xff]  ;;  %v424_v7 = vld [vmem:[#allocation7 + $0x70] sm:$0xff]  ;;  %v1086_v49 = vpack.c.bf16 %v444_v48, %v441_v47 }
  0x7e   : > { %1056 = vmatpush3.bf16.msra.mxu0 %v1055_v52  ;;  %v265_v35 = vadd.f32 %v264_v25, %v263_v3  ;;  %v283_v38 = vadd.f32 %v282_v26, %v281_v4  ;;  %v412_v52 = vld [vmem:[#allocation7 + $0x10] sm:$0xff]  ;;  %1071 = vmatprep.subr.bf16.mxu1 %v1070_v58  ;;  %v1102_v63 = vpack.c.bf16 %v421_v62, %v418_v61  ;;  %v426_v3 = vld [vmem:[#allocation7 + $0x80] sm:$0xff]  ;;  %v425_v6 = vld [vmem:[#allocation7 + $0x78] sm:$0xff] }
  0x7f   : > { %1057 = vmatprep.subr.bf16.mxu0 %v1383_v0  ;;  %v266_v37 = vadd.f32 %v258_v31, %v235_v24  ;;  %v290_v39 = vadd.f32 %v289_v34, %v288_v8  ;;  %v1099_v55 = vpack.c.bf16 %v415_v54, %v412_v52  ;;  %v1074_v4 = vpack.c.bf16 %v426_v3, %v423_v2  ;;  %v429_v24 = vld [vmem:[#allocation7 + $0x98] sm:$0xff]  ;;  %v432_v25 = vld [vmem:[#allocation7 + $0xb0] sm:$0xff]  ;;  %v431_v31 = vld [vmem:[#allocation7 + $0xa8] sm:$0xff] }
  0x80   : > { %v267_v42 = vadd.f32 %v265_v35, %v242_v30  ;;  %v1105_v12 = vpack.c.bf16 %v427_v9, %v424_v7  ;;  %v1078_v26 = vpack.c.bf16 %v432_v25, %v429_v24  ;;  %v428_v30 = vld [vmem:[#allocation7 + $0x90] sm:$0xff]  ;;  %v430_v34 = vld [vmem:[#allocation7 + $0xa0] sm:$0xff]  ;;  %v443_v51 = vld [vmem:[#allocation7 + $0x108] sm:$0xff] }
  0x81   : > { %v291_v44 = vadd.f32 %v283_v38, %v266_v37  ;;  %v1080_v35 = vpack.c.bf16 %v431_v31, %v428_v30  ;;  %v435_v38 = vld [vmem:[#allocation7 + $0xc8] sm:$0xff]  ;;  %v440_v50 = vld [vmem:[#allocation7 + $0xf0] sm:$0xff]  ;;  %v442_v52 = vld [vmem:[#allocation7 + $0x100] sm:$0xff] }
  0x82   : > { %1059 = vmatpush3.bf16.msra.mxu0 %v1058_v5  ;;  %v292_v45 = vadd.f32 %v290_v39, %v267_v42  ;;  %v422_v5 = vld [vmem:[#allocation7 + $0x60] sm:$0xff]  ;;  %v437_v42 = vld [vmem:[#allocation7 + $0xd8] sm:$0xff]  ;;  %v1088_v53 = vpack.c.bf16 %v443_v51, %v440_v50  ;;  %v447_v56 = vld [vmem:[#allocation7 + $0x128] sm:$0xff] }
  0x83   : > { %1060 = vmatprep.subr.bf16.mxu0 %v1383_v0  ;;  %v1076_v8 = vpack.c.bf16 %v425_v6, %v422_v5  ;;  %v438_v39 = vld [vmem:[#allocation7 + $0xe0] sm:$0xff]  ;;  %v445_v54 = vld [vmem:[#allocation7 + $0x118] sm:$0xff]  ;;  %v1090_v58 = vpack.c.bf16 %v450_v57, %v447_v56  ;;  %v448_v61 = vld [vmem:[#allocation7 + $0x130] sm:$0xff] }
  0x84   : > { %v312_v46 = vsel %vm311_vm1, %v292_v45, %v291_v44  ;;  %v1082_v40 = vpack.c.bf16 %v438_v39, %v435_v38  ;;  %v1084_v44 = vpack.c.bf16 %v437_v42, %v434_v41  ;;  %v439_v45 = vld [vmem:[#allocation7 + $0xe8] sm:$0xff]  ;;  %v453_v2 = vld [vmem:[#allocation7 + $0x158] sm:$0xff]  ;;  %v456_v3 = vld [vmem:[#allocation7 + $0x170] sm:$0xff] }
  0x85   : > { %v451_v62 = vld [vmem:[#allocation7 + $0x148] sm:$0xff]  ;;  %v452_v5 = vld [vmem:[#allocation7 + $0x150] sm:$0xff]  ;;  %v454_v7 = vld [vmem:[#allocation7 + $0x160] sm:$0xff] }
  0x86   : > { %1062 = vmatpush3.bf16.msra.mxu0 %v1061_v36  ;;  %v433_v36 = vld [vmem:[#allocation7 + $0xb8] sm:$0xff]  ;;  %v455_v6 = vld [vmem:[#allocation7 + $0x168] sm:$0xff] }
  0x87   : > { %1063 = vmatprep.subr.bf16.mxu0 %v1383_v0  ;;  %v1108_v37 = vpack.c.bf16 %v433_v36, %v430_v34  ;;  %v457_v9 = vld [vmem:[#allocation7 + $0x178] sm:$0xff] }
  0x8a   : > { %1065 = vmatpush3.bf16.msra.mxu0 %v1064_v43  ;;  %v436_v43 = vld [vmem:[#allocation7 + $0xd0] sm:$0xff] }
  0x8b   : > { %1098 = vmatprep.subr.bf16.mxu0 %v1383_v0 }
  0x8d   : > { %1005 = vmatmul.mubr.f32.vlgmr.msra.gmra.mrb[0].mxu0 %v312_v46  ;;  %v1111_v46 = vpack.c.bf16 %v439_v45, %v436_v43 }
  0x8e   : > { %1039 = vmatprep.mubr.msk.f32.mxu0 %vm1384_vm0, %v1385_v1  ;;  %1100 = vmatpush3.bf16.msra.mxu0 %v1099_v55  ;;  %v1072_v1 = vpack.c.bf16 %v419_v60, %v416_v59  ;;  %v1114_v55 = vpack.c.bf16 %v445_v54, %v442_v52  ;;  %v446_v59 = vld [vmem:[#allocation7 + $0x120] sm:$0xff]  ;;  %v449_v60 = vld [vmem:[#allocation7 + $0x138] sm:$0xff] }
  0x8f   : > { %1101 = vmatprep.subr.bf16.mxu0 %v1383_v0 }
  0x90   : > { %1073 = vmatpush1.bf16.msra.mxu1 %v1072_v1  ;;  %v1092_v1 = vpack.c.bf16 %v449_v60, %v446_v59 }
  0x91   : > { %1075 = vmatprep.subr.bf16.mxu1 %v1074_v4  ;;  %v1094_v4 = vpack.c.bf16 %v456_v3, %v453_v2 }
  0x92   : > { %1103 = vmatpush3.bf16.msra.mxu0 %v1102_v63  ;;  %v1117_v63 = vpack.c.bf16 %v451_v62, %v448_v61 }
  0x93   : > { %1104 = vmatprep.subr.bf16.mxu0 %v1383_v0 }
  0x94   : > { %1077 = vmatpush1.bf16.msra.mxu1 %v1076_v8  ;;  %v1096_v8 = vpack.c.bf16 %v455_v6, %v452_v5 }
  0x95   : > { %1079 = vmatprep.subr.bf16.mxu1 %v1078_v26 }
  0x96   : > { %1106 = vmatpush3.bf16.msra.mxu0 %v1105_v12  ;;  %v1120_v12 = vpack.c.bf16 %v457_v9, %v454_v7  ;;  %v1386_v9 = vmov 1966171168  }
  0x97   : > { %1107 = vmatprep.subr.bf16.mxu0 %v1383_v0 }
  0x98   : > { %1081 = vmatpush1.bf16.msra.mxu1 %v1080_v35 }
  0x99   : > { %1083 = vmatprep.subr.bf16.mxu1 %v1082_v40 }
  0x9a   : > { %1109 = vmatpush3.bf16.msra.mxu0 %v1108_v37 }
  0x9b   : > { %1110 = vmatprep.subr.bf16.mxu0 %v1383_v0 }
  0x9c   : > { %1085 = vmatpush1.bf16.msra.mxu1 %v1084_v44 }
  0x9d   : > { %1087 = vmatprep.subr.bf16.mxu1 %v1086_v49 }
  0x9e   : > { %1112 = vmatpush3.bf16.msra.mxu0 %v1111_v46 }
  0x9f   : > { %1113 = vmatprep.subr.bf16.mxu0 %v1383_v0 }
  0xa0   : > { %1089 = vmatpush1.bf16.msra.mxu1 %v1088_v53 }
  0xa1   : > { %1091 = vmatprep.subr.bf16.mxu1 %v1090_v58 }
  0xa2   : > { %1115 = vmatpush3.bf16.msra.mxu0 %v1114_v55 }
  0xa3   : > { %1116 = vmatprep.subr.bf16.mxu0 %v1383_v0 }
  0xa4   : > { %1093 = vmatpush1.bf16.msra.mxu1 %v1092_v1 }
  0xa5   : > { %1095 = vmatprep.subr.bf16.mxu1 %v1094_v4 }
  0xa6   : > { %1118 = vmatpush3.bf16.msra.mxu0 %v1117_v63 }
  0xa7   : > { %1119 = vmatprep.subr.bf16.mxu0 %v1383_v0 }
  0xa8   : > { %1097 = vmatpush1.bf16.msra.mxu1 %v1096_v8 }
  0xaa   : > { %1121 = vmatpush3.bf16.msra.mxu0 %v1120_v12  ;;  %v616_v12 = vunpack.c.l.s4 %v1386_v9 }
 0x160   : > { %v380_v24 = vpop.f32.mrb[0].mxu0 }
 0x161   : > { %v385_v25 = vmul.f32 0.70710677, %v380_v24  ;;  %v1006_v26 = vpop.f32.mrb[1].mxu0  ;;  %v384_v52 = vmul.f32 0.5, %v380_v24  ;;  %v618_v24 = vlaneseq }
 0x163   : > { %v386_v30 = vand.u32 2147483647, %v385_v25  ;;  %vm405_vm2 = vcmp.lt.f32.partialorder %v385_v25, 0.0  ;;  %v617_v25 = vunpack.c.0.s8 %v616_v12  ;;  %v619_v26 = vshrl.u32 %v618_v24, 7 }
 0x165   : > { %v387_v31 = vmul.f32 0.3275911, %v386_v30  ;;  %v399_v35 = vsub.f32 0.0, %v386_v30 }
 0x167   : > { %v388_v34 = vadd.f32 1.0, %v387_v31  ;;  %v400_v37 = vmul.f32 %v399_v35, %v386_v30  ;;  %v620_v30 = vsub.s32 %v617_v25, %v619_v26 }
 0x169   : > { %1204 = vrcp.f32 %v388_v34  ;;  %v401_v40 = vmul.f32 1.442695, %v400_v37 }
 0x16b   : > { %1206 = vpow2.f32 %v401_v40  ;;  %v687_v40 = vsub.s32 0, %v619_v26 }
 0x173   : > { %v1205_v36 = vpop.eup %1204 }
 0x174   : > { %v390_v38 = vmul.f32 1.0614054, %v1205_v36 }
 0x175   : > { %v1207_v47 = vpop.eup %1206 }
 0x176   : > { %v391_v39 = vadd.f32 -1.4531521, %v390_v38 }
 0x178   : > { %v392_v0 = vmul.f32 %v1205_v36, %v391_v39 }
 0x17a   : > { %v393_v41 = vadd.f32 1.4214138, %v392_v0 }
 0x17c   : > { %v394_v42 = vmul.f32 %v1205_v36, %v393_v41 }
 0x17e   : > { %v395_v43 = vadd.f32 -0.28449672, %v394_v42 }
 0x180   : > { %v396_v44 = vmul.f32 %v1205_v36, %v395_v43 }
 0x182   : > { %v397_v45 = vadd.f32 0.2548296, %v396_v44 }
 0x184   : > { %v398_v46 = vmul.f32 %v1205_v36, %v397_v45 }
 0x186   : > { %v403_v48 = vmul.f32 %v1207_v47, %v398_v46 }
 0x188   : > { %v404_v49 = vsub.f32 1.0, %v403_v48 }
 0x18a   : > { %v406_v50 = vsub.f32 0.0, %v404_v49 }
 0x18c   : > { %v407_v51 = vsel %vm405_vm2, %v406_v50, %v404_v49 }
 0x18d   : > { %v408_v53 = vadd.f32 1.0, %v407_v51 }
 0x18f   : > { %v409_v54 = vmul.f32 %v408_v53, %v384_v52 }
 0x191   : > { %523 = vmatmul.mubr.f32.vlgmr.msra.gmra.mrb[0].mxu1 %v409_v54  ;;  %1040 = vmatmul.mubr.f32.vlgmr.msra.gmra.mrb[2].mxu0 %v409_v54 }
 0x264   : > { %v524_v55 = vpop.f32.mrb[0].mxu1  ;;  %v595_v56 = vpop.f32.mrb[2].mxu0 }
 0x265   : > { %v526_v57 = vpop.f32.mrb[1].mxu1  ;;  %v1041_v58 = vpop.f32.mrb[3].mxu0 }
 0x266   : > { %v599_v59 = vmax.f32 %v524_v55, %v526_v57 }
 0x268   : > { %v600_v60 = vmax.f32 %v599_v59, %v595_v56 }
 0x26a   : > { %v601_v61 = vsub.f32 %v524_v55, %v600_v60  ;;  %v604_v1 = vsub.f32 %v526_v57, %v600_v60  ;;  %v607_v62 = vsub.f32 %v595_v56, %v600_v60 }
 0x26c   : > { %v602_v63 = vmul.f32 1.442695, %v601_v61  ;;  %v605_v2 = vmul.f32 1.442695, %v604_v1  ;;  %v608_v3 = vmul.f32 1.442695, %v607_v62 }
 0x26e   : > { %1208 = vpow2.f32 %v602_v63 }
 0x26f   : > { %1210 = vpow2.f32 %v605_v2 }
 0x270   : > { %1212 = vpow2.f32 %v608_v3 }
 0x278   : > { %v1209_v4 = vpop.eup %1208 }
 0x279   : > { %v1211_v5 = vpop.eup %1210 }
 0x27a   : > { %v610_v6 = vadd.f32 %v1211_v5, %v1209_v4  ;;  %v1213_v7 = vpop.eup %1212 }
 0x27c   : > { %v611_v8 = vadd.f32 %v1213_v7, %v610_v6 }
 0x27e   : > { %1214 = vrcp.f32 %v611_v8 }
 0x288   : > { %v1215_v31 = vpop.eup %1214 }
 0x289   : > { %v613_v34 = vmul.f32 %v1215_v31, %v1209_v4  ;;  %v637_v35 = vmul.f32 %v1215_v31, %v1211_v5  ;;  %v661_v36 = vmul.f32 %v1215_v31, %v1213_v7 }
 0x28b   : > { %v621_v37 = vrot.slane %v613_v34, %v620_v30  ;;  %v645_v38 = vrot.slane %v637_v35, %v620_v30  ;;  %v669_v39 = vrot.slane %v661_v36, %v620_v30 }
 0x28d   : > { %v622_v0 = vcombine.high %v621_v37, %v621_v37  ;;  %v629_v41 = vrot.slane %v621_v37, %v620_v30  ;;  %v646_v42 = vcombine.high %v645_v38, %v645_v38  ;;  %v653_v43 = vrot.slane %v645_v38, %v620_v30 }
 0x28e   : > { %v670_v44 = vcombine.high %v669_v39, %v669_v39  ;;  %v677_v45 = vrot.slane %v669_v39, %v620_v30 }
 0x28f   : > { %v636_v46 = vrot.slane %v622_v0, %v620_v30  ;;  %v660_v47 = vrot.slane %v646_v42, %v620_v30  ;;  %v688_v48 = vrot.slane %v629_v41, %v687_v40  ;;  %v702_v49 = vrot.slane %v653_v43, %v687_v40 }
 0x290   : > { %v684_v50 = vrot.slane %v670_v44, %v620_v30  ;;  %v720_v51 = vrot.slane %v677_v45, %v687_v40 }
 0x291   : > { %v692_v52 = vrot.slane %v636_v46, %v687_v40  ;;  %v695_v53 = vmul.f32 %v900_v13, %v688_v48  ;;  %v696_v54 = vmul.f32 %v901_v14, %v688_v48  ;;  %v706_v55 = vrot.slane %v660_v47, %v687_v40 }
 0x292   : > { %v709_v56 = vmul.f32 %v908_v20, %v702_v49  ;;  %v710_v57 = vmul.f32 %v909_v21, %v702_v49  ;;  %v724_v58 = vrot.slane %v684_v50, %v687_v40  ;;  %v727_v20 = vmul.f32 %v916_v28, %v720_v51 }
 0x293   : > { %v711_v59 = vmul.f32 %v912_v22, %v706_v55  ;;  %v712_v60 = vmul.f32 %v913_v27, %v706_v55  ;;  %v697_v13 = vmul.f32 %v904_v15, %v692_v52  ;;  %v698_v10 = vmul.f32 %v905_v19, %v692_v52 }
 0x294   : > { %v713_v14 = vadd.f32 %v709_v56, %v695_v53  ;;  %v714_v61 = vadd.f32 %v710_v57, %v696_v54  ;;  %v728_v16 = vmul.f32 %v917_v29, %v720_v51  ;;  %v729_v17 = vmul.f32 %v920_v32, %v724_v58 }
 0x295   : > { %v715_v21 = vadd.f32 %v711_v59, %v697_v13  ;;  %v716_v1 = vadd.f32 %v712_v60, %v698_v10  ;;  %v730_v15 = vmul.f32 %v921_v33, %v724_v58 }
 0x296   : > { %v731_v11 = vadd.f32 %v727_v20, %v713_v14  ;;  %v732_v19 = vadd.f32 %v728_v16, %v714_v61 }
 0x297   : > { %v733_v22 = vadd.f32 %v729_v17, %v715_v21  ;;  %v734_v27 = vadd.f32 %v730_v15, %v716_v1 }
 0x298   : > { %v925_v28 = vpack.c.bf16 %v732_v19, %v731_v11 }
 0x299   : > { %v930_v18 = vpack.c.bf16 %v734_v27, %v733_v22 }
 0x29a   : > { %926 = vst [vmem:[%s218_s17] sm:$0xff] %v925_v28  }
 0x29b   : > { %937 = vst [vmem:[%s218_s17 + $0x8] sm:$0xff] %v930_v18  }
 0x29c   : > { %1315 = shalt.err (!%p1312_p2)
}
 0x29d   : > { %s1316_s21 = scalar_lea.hbm %s1700_s7, 256  ;;  %s1320_s30 = scalar_lea.hbm %s1749_s3, 512 }
 0x29e   : > { %p1317_p13 = scmp.ne.s32.totalorder %s1700_s7, %s1316_s21  ;;  %p1321_p4 = scmp.lt.u32.totalorder %s1700_s7, %s1749_s3 }
 0x29f   : > { %p1322_p7 = scmp.lt.u32.totalorder %s1320_s30, %s1316_s21  ;;  %p1324_p11 = scmp.lt.u32.totalorder %s1316_s21, %s1700_s7 }
 0x2a0   : > { %p1318_p6 = pnand %p1317_p13, %p1763_p0 }
 0x2a1   : > { %p1323_p8 = por %p1322_p7, %p1321_p4 }
 0x2a2   : > { %p1319_p10 = pneg %p1318_p6 }
 0x2a3   : > { %p1325_p1 = por %p1324_p11, %p1323_p8 }
 0x2a5   : > { %p1326_p3 = pnand %p1325_p1, %p1319_p10 }
 0x2a7   : > { %1329 = shalt.err (!%p1326_p3)
}
 0x2a8   : > { %s1388_s18 = smov 64   ;;  %s1389_s20 = smov 4  }
 0x2a9   : > { %1135 = dma.vmem_to_hbm [thread:$0]  (%p1763_p0), %s1702_s26, 256, %s1700_s7, %s756_s16, %s1388_s18, %s1388_s18, %s1389_s20  }
 0x2aa PF: > { %s785_s17 = sand.u32 1, %s1360_s12   ;;  %p1764_p5 = scmp.ne.s32.totalorder %s1754_s19, 0 }
 0x2ab   : > { %p1765_p9 = scmp.ge.s32.totalorder %s1372_s15, 2  ;;  %s786_s28 = scalar_lea.sflag [#allocation4], %s785_s17 }
 0x2ad   : > { %p1149_p12 = pnand %p1765_p9, %p1764_p5 }
 0x2af   : > { %1355 = dma.done.wait (!%p1149_p12), %s786_s28, 256  }
 0x2b0   : > { %1357 = vsyncadd (!%p1149_p12), %s786_s28, 4294967040  ;;  %p17_p2 = scmp.ge.s32.totalorder %s1520_s6, 4   ;;  %s1766_s12 = smov %s1364_s13 }
 0x2b1   : > { %s1767_s13 = smov %s1368_s14  ;;  %s1768_s14 = smov %s1529_s9 }
 0x2b2   : > { %s1769_s15 = smov %s1520_s6  ;;  %19 = sbr.rel (!%p17_p2) target bundleno = 6 (0x6), region = 87 }
 0x2b9   :  { %791 = vsyncpa [#allocation3], 1 }
 0x2ba   :  { %793 = vsyncpa [#allocation3 + $0x1], 1 }
 0x2bb   :  { %794 = vsyncpa [#allocation6], 1 }
 0x2bc   :  { %795 = vsyncpa [#allocation4], 1 }
 0x2bd   :  { %797 = vsyncpa [#allocation4 + $0x1], 1 }

</bundles_post_ra>
